<compile_context>
chip_gen: v6e
topology: v6e:2x2x1
jax: 0.10.0
libtpu: 0.0.40
codegen_flags: <defaults>
</compile_context>

<pallas_src>
import jax
import jax.numpy as jnp
from jax.experimental import pallas as pl
from jax.experimental.pallas import tpu as pltpu


def _round_up(x, m):
    return ((x + m - 1) // m) * m


def _vmem_budget():
    """(scoped vmem limit, tile-planning budget) in bytes, derived from the chip."""
    try:
        info = pltpu.get_tpu_info()
        cap = int(getattr(info, "vmem_capacity_bytes", 0)) or (64 << 20)
    except Exception:  # no query available -> assume smallest (v7x per-TC VMEM)
        cap = 64 << 20
    limit = min(96 << 20, int(0.60 * cap))   # ~38 MiB on v7x, ~76 MiB on v5e/v6e
    budget = int(0.80 * limit)               # headroom for compiler scratch / spill
    return limit, budget


def _choose_tiles(n, dim, dim_out, x_bytes, w_bytes, out_bytes, budget):
    """Pick (block_m, tn) so the per-step working set fits the VMEM budget."""
    # Column tile: prefer the full width (weight resident + fetched exactly once);
    # otherwise the largest 256-multiple tile that fits half the budget.
    weight_budget = budget // 2
    tn = dim_out
    if dim * dim_out * w_bytes > weight_budget:
        for cand in (2048, 1024, 512, 256, 128):
            if dim_out % cand == 0 and dim * cand * w_bytes <= weight_budget:
                tn = cand
                break
        else:
            tn = 128 if dim_out % 128 == 0 else dim_out
    # Row tile: biggest power-of-two block that fits next to the (single-buffered,
    # grid-invariant along rows) weight tile.
    const_bytes = dim * tn * w_bytes + tn * 4
    bm = 1024
    while bm > 8:
        per_buf = bm * (dim * x_bytes + tn * out_bytes)   # x block + out block
        acc_tmp = bm * tn * 4                             # f32 matmul result temp
        if 2 * per_buf + acc_tmp + const_bytes <= budget:
            break
        bm //= 2
    bm = max(8, min(bm, _round_up(n, 8)))
    return bm, tn


def _proj_plus_residual_kernel(x_ref, wt_ref, b_ref, o_ref):
    # x_ref : (BM, dim)    token rows (input dtype; cast to matmul dtype on VPU)
    # wt_ref: (dim, TN)    folded weight tile  (W^T + E)
    # b_ref : (1, TN)      bias tile (f32)
    # o_ref : (BM, TN)     out = x @ (W^T + E) + bias   (residual already folded in)
    x = x_ref[...].astype(wt_ref.dtype)
    acc = jnp.dot(x, wt_ref[...], preferred_element_type=jnp.float32)
    o_ref[...] = (acc + b_ref[...]).astype(o_ref.dtype)


def prepare_residual_upsample_params(weight, bias, *, space=False, time=False,
                                     repeat_channels=None,
                                     compute_dtype=jnp.bfloat16):
    """One-time parameter prep (do NOT call per forward).

    weight: (dim*r, dim) torch Linear layout; bias: (dim*r,).
    Returns (wt, bias2, cfg) where wt = (W^T + E) cast to compute_dtype (the fold is
    done in f32), bias2 is the f32 bias row, and cfg = (ft, fs, repeat).
    """
    assert space or time
    fs = 2 if space else 1
    ft = 2 if time else 1
    repeat = repeat_channels if repeat_channels is not None else fs
    factor = ft * fs * fs

    dim_out, dim = weight.shape
    assert dim % factor == 0, "dim must be divisible by ft*fsh*fsw"
    assert dim_out == dim * repeat
    assert bias.shape == (dim_out,)
    d_small = dim // factor

    # Channel-expand residual as a 0/1 matrix:
    #   E[f*d_small + c, (f*repeat + k)*d_small + c] = 1
    eye = jnp.eye(dim, dtype=jnp.float32).reshape(factor, d_small, factor, 1, d_small)
    expand = jnp.broadcast_to(eye, (factor, d_small, factor, repeat, d_small))
    expand = expand.reshape(dim, dim_out)

    wt = (jnp.transpose(weight).astype(jnp.float32) + expand).astype(compute_dtype)
    bias2 = bias.reshape(1, dim_out).astype(jnp.float32)
    return wt, bias2, (ft, fs, repeat)


def residual_upsample(feats, wt, bias2, cfg, *, out_dtype=None):
    """feats: (b, t, h, w, dim); wt/bias2/cfg from prepare_residual_upsample_params."""
    ft, fs, repeat = cfg
    factor = ft * fs * fs
    b, t, h, w, dim = feats.shape
    assert wt.shape[0] == dim
    dim_out = wt.shape[1]
    d_out = dim_out // factor
    out_dtype = feats.dtype if out_dtype is None else out_dtype

    n = b * t * h * w
    x = feats.reshape(n, dim)

    x_bytes = x.dtype.itemsize
    w_bytes = wt.dtype.itemsize
    out_bytes = jnp.dtype(out_dtype).itemsize
    vmem_limit, budget = _vmem_budget()
    block_m, tn = _choose_tiles(n, dim, dim_out, x_bytes, w_bytes, out_bytes, budget)
    gm = pl.cdiv(n, block_m)       # row tiles (inner, partial last block allowed)
    gn = dim_out // tn             # column tiles (outer)

    cost = pl.CostEstimate(
        flops=2 * n * dim * dim_out,
        transcendentals=0,
        bytes_accessed=(n * dim * x_bytes * gn + dim * dim_out * w_bytes
                        + dim_out * 4 + n * dim_out * out_bytes))

    def make_call(single_buffer_params):
        pm = {"pipeline_mode": pl.Buffered(1)} if single_buffer_params else {}
        grid_spec = pltpu.PrefetchScalarGridSpec(
            num_scalar_prefetch=0,
            grid=(gn, gm),                                     # columns outer, rows inner
            in_specs=[
                pl.BlockSpec((block_m, dim), lambda j, i: (i, 0)),
                pl.BlockSpec((dim, tn), lambda j, i: (0, j), **pm),
                pl.BlockSpec((1, tn), lambda j, i: (0, j), **pm),
            ],
            out_specs=pl.BlockSpec((block_m, tn), lambda j, i: (i, j)),
        )
        return pl.pallas_call(
            _proj_plus_residual_kernel,
            out_shape=jax.ShapeDtypeStruct((n, dim_out), out_dtype),
            grid_spec=grid_spec,
            compiler_params=pltpu.CompilerParams(
                dimension_semantics=("parallel", "parallel"),
                vmem_limit_bytes=vmem_limit),
            cost_estimate=cost,
        )

    try:
        z = make_call(True)(x, wt, bias2)
    except Exception:
        # Fallback if this JAX build rejects single-buffered (pl.Buffered(1)) operands.
        z = make_call(False)(x, wt, bias2)

    # to_residual pixel-shuffle: pure layout plumbing on the (repeat x larger) output.
    # TODO(synk): under jit this transpose should be fused into the downstream
    # consumer; otherwise write the kernel output directly in
    # (b, t, ft, h, fs, w, fs, d_out) order via a (b*t*h)-grid variant when
    # d_out is a multiple of 128 to avoid the extra HBM round trip.
    z = z.reshape(b, t, h, w, ft, fs, fs, d_out)
    z = jnp.transpose(z, (0, 1, 4, 2, 5, 3, 6, 7))
    return z.reshape(b, t * ft, h * fs, w * fs, d_out)


def residual_upsample_ref(feats, weight, bias, *, space=False, time=False,
                          repeat_channels=None):
    """Pure-JAX reference mirroring the PyTorch forward."""
    assert space or time
    fs = 2 if space else 1
    ft = 2 if time else 1
    repeat = repeat_channels if repeat_channels is not None else fs
    factor = ft * fs * fs
    b, t, h, w, dim = feats.shape

    def to_residual(x):
        dd = x.shape[-1] // factor
        x = x.reshape(b, t, h, w, ft, fs, fs, dd)
        x = jnp.transpose(x, (0, 1, 4, 2, 5, 3, 6, 7))
        return x.reshape(b, t * ft, h * fs, w * fs, dd)

    residual = to_residual(feats)                               # (..., d_small)
    expanded = jnp.tile(residual, (1, 1, 1, 1, repeat))         # '... d -> ... (r d)'
    learned = jnp.einsum('bthwd,od->bthwo', feats, weight,
                         precision=jax.lax.Precision.HIGHEST) + bias
    learned = to_residual(learned)
    return expanded + learned


if __name__ == "__main__":
    # space-only upsample: ft=1, fsh=fsw=2, repeat_factor=2
    b, t, h, w, dim = 2, 3, 4, 4, 64
    repeat = 2
    key = jax.random.PRNGKey(0)
    k1, k2, k3 = jax.random.split(key, 3)
    feats = jax.random.normal(k1, (b, t, h, w, dim), dtype=jnp.float32)
    # torch initializes proj to zeros; use non-zero params to exercise the matmul path
    weight = 0.02 * jax.random.normal(k2, (dim * repeat, dim), dtype=jnp.float32)
    bias = 0.02 * jax.random.normal(k3, (dim * repeat,), dtype=jnp.float32)

    ref = residual_upsample_ref(feats, weight, bias, space=True, time=False)
    expected_shape = (b, t, 2 * h, 2 * w, dim * repeat // 4)

    # Default path: bf16 MXU matmul (residual + learned both through the MXU).
    wt_bf16, bias2, cfg = prepare_residual_upsample_params(
        weight, bias, space=True, time=False, compute_dtype=jnp.bfloat16)
    out = jax.block_until_ready(residual_upsample(feats, wt_bf16, bias2, cfg))
    assert out.shape == expected_shape and out.shape == ref.shape, out.shape
    # bf16 rounding of x and of the folded (1 + w) diagonal -> relaxed tolerance.
    assert jnp.allclose(out, ref, atol=5e-2, rtol=5e-2), (
        float(jnp.max(jnp.abs(out - ref))))

    # f32 path: exact residual fold, tight numerics.
    wt_f32, bias2_f32, cfg_f32 = prepare_residual_upsample_params(
        weight, bias, space=True, time=False, compute_dtype=jnp.float32)
    out32 = jax.block_until_ready(residual_upsample(feats, wt_f32, bias2_f32, cfg_f32))
    assert out32.shape == ref.shape
    assert jnp.allclose(out32, ref, atol=5e-3, rtol=5e-3), (
        float(jnp.max(jnp.abs(out32 - ref))))

    print("KERNEL_OK")
</pallas_src>

<mosaic_0001>
module attributes {stable_mosaic.version = 11 : i64} {
  func.func @_proj_plus_residual_kernel(%arg0: i32, %arg1: i32, %arg2: memref<96x64xf32, #tpu.memory_space<vmem>>, %arg3: memref<64x128xbf16, #tpu.memory_space<vmem>>, %arg4: memref<1x128xf32, #tpu.memory_space<vmem>>, %arg5: memref<96x128xf32, #tpu.memory_space<vmem>>) attributes {dimension_semantics = [#tpu.dimension_semantics<parallel>, #tpu.dimension_semantics<parallel>], iteration_bounds = array<i64: 1, 1>, scalar_prefetch = 0 : i64, scratch_operands = 0 : i64, tpu.core_type = #tpu.core_type<tc>, window_params = [{transform_indices = @transform_0, window_bounds = array<i64: 96, 64>}, {pipeline_mode = #tpu.pipeline_mode<synchronous>, transform_indices = @transform_1, window_bounds = array<i64: 64, 128>}, {pipeline_mode = #tpu.pipeline_mode<synchronous>, transform_indices = @transform_2, window_bounds = array<i64: 1, 128>}, {transform_indices = @transform_3, window_bounds = array<i64: 96, 128>}]} {
    %c0 = arith.constant 0 : index
    %c0_0 = arith.constant 0 : index
    %0 = vector.load %arg2[%c0, %c0_0] : memref<96x64xf32, #tpu.memory_space<vmem>>, vector<96x64xf32>
    %1 = arith.truncf %0 : vector<96x64xf32> to vector<96x64xbf16>
    %c0_1 = arith.constant 0 : index
    %c0_2 = arith.constant 0 : index
    %2 = vector.load %arg3[%c0_1, %c0_2] : memref<64x128xbf16, #tpu.memory_space<vmem>>, vector<64x128xbf16>
    %cst = arith.constant dense<0.000000e+00> : vector<96x128xf32>
    %3 = tpu.matmul %1, %2, %cst {dimension_numbers = #tpu.dot_dimension_numbers<[1], [0], [0], [1], [0, 0, 1, 1], [], []>} : vector<96x64xbf16>, vector<64x128xbf16>, vector<96x128xf32> -> vector<96x128xf32>
    %c0_3 = arith.constant 0 : index
    %c0_4 = arith.constant 0 : index
    %4 = vector.load %arg4[%c0_3, %c0_4] : memref<1x128xf32, #tpu.memory_space<vmem>>, vector<1x128xf32>
    %5 = vector.broadcast %4 : vector<1x128xf32> to vector<96x128xf32>
    %6 = arith.addf %3, %5 : vector<96x128xf32>
    %c0_5 = arith.constant 0 : index
    %c0_6 = arith.constant 0 : index
    %7 = vector.load %arg5[%c0_5, %c0_6] : memref<96x128xf32, #tpu.memory_space<vmem>>, vector<96x128xf32>
    tpu.vector_store %arg5[%c0_5, %c0_6], %6 {strides = array<i32>} : memref<96x128xf32, #tpu.memory_space<vmem>>, vector<96x128xf32>,
    return
  }
  func.func @transform_0(%arg0: i32, %arg1: i32) -> (i32, i32) {
    %c0_i32 = arith.constant 0 : i32
    %c0_i32_0 = arith.constant 0 : i32
    return %arg1, %c0_i32 : i32, i32
  }
  func.func @transform_1(%arg0: i32, %arg1: i32) -> (i32, i32) {
    %c0_i32 = arith.constant 0 : i32
    %c0_i32_0 = arith.constant 0 : i32
    return %c0_i32, %arg0 : i32, i32
  }
  func.func @transform_2(%arg0: i32, %arg1: i32) -> (i32, i32) {
    %c0_i32 = arith.constant 0 : i32
    %c0_i32_0 = arith.constant 0 : i32
    return %c0_i32, %arg0 : i32, i32
  }
  func.func @transform_3(%arg0: i32, %arg1: i32) -> (i32, i32) {
    %c0_i32 = arith.constant 0 : i32
    return %arg1, %arg0 : i32, i32
  }
}

module attributes {stable_mosaic.version = 11 : i64} {
  func.func @_proj_plus_residual_kernel(%arg0: i32, %arg1: i32, %arg2: memref<96x64xf32, #tpu.memory_space<vmem>>, %arg3: memref<64x128xbf16, #tpu.memory_space<vmem>>, %arg4: memref<1x128xf32, #tpu.memory_space<vmem>>, %arg5: memref<96x128xf32, #tpu.memory_space<vmem>>) attributes {dimension_semantics = [#tpu.dimension_semantics<parallel>, #tpu.dimension_semantics<parallel>], iteration_bounds = array<i64: 1, 1>, scalar_prefetch = 0 : i64, scratch_operands = 0 : i64, tpu.core_type = #tpu.core_type<tc>, window_params = [{transform_indices = @transform_0, window_bounds = array<i64: 96, 64>}, {transform_indices = @transform_1, window_bounds = array<i64: 64, 128>}, {transform_indices = @transform_2, window_bounds = array<i64: 1, 128>}, {transform_indices = @transform_3, window_bounds = array<i64: 96, 128>}]} {
    %c0 = arith.constant 0 : index
    %c0_0 = arith.constant 0 : index
    %0 = vector.load %arg2[%c0, %c0_0] : memref<96x64xf32, #tpu.memory_space<vmem>>, vector<96x64xf32>
    %1 = arith.truncf %0 : vector<96x64xf32> to vector<96x64xbf16>
    %c0_1 = arith.constant 0 : index
    %c0_2 = arith.constant 0 : index
    %2 = vector.load %arg3[%c0_1, %c0_2] : memref<64x128xbf16, #tpu.memory_space<vmem>>, vector<64x128xbf16>
    %cst = arith.constant dense<0.000000e+00> : vector<96x128xf32>
    %3 = tpu.matmul %1, %2, %cst {dimension_numbers = #tpu.dot_dimension_numbers<[1], [0], [0], [1], [0, 0, 1, 1], [], []>} : vector<96x64xbf16>, vector<64x128xbf16>, vector<96x128xf32> -> vector<96x128xf32>
    %c0_3 = arith.constant 0 : index
    %c0_4 = arith.constant 0 : index
    %4 = vector.load %arg4[%c0_3, %c0_4] : memref<1x128xf32, #tpu.memory_space<vmem>>, vector<1x128xf32>
    %5 = vector.broadcast %4 : vector<1x128xf32> to vector<96x128xf32>
    %6 = arith.addf %3, %5 : vector<96x128xf32>
    %c0_5 = arith.constant 0 : index
    %c0_6 = arith.constant 0 : index
    %7 = vector.load %arg5[%c0_5, %c0_6] : memref<96x128xf32, #tpu.memory_space<vmem>>, vector<96x128xf32>
    tpu.vector_store %arg5[%c0_5, %c0_6], %6 {strides = array<i32>} : memref<96x128xf32, #tpu.memory_space<vmem>>, vector<96x128xf32>,
    return
  }
  func.func @transform_0(%arg0: i32, %arg1: i32) -> (i32, i32) {
    %c0_i32 = arith.constant 0 : i32
    %c0_i32_0 = arith.constant 0 : i32
    return %arg1, %c0_i32 : i32, i32
  }
  func.func @transform_1(%arg0: i32, %arg1: i32) -> (i32, i32) {
    %c0_i32 = arith.constant 0 : i32
    %c0_i32_0 = arith.constant 0 : i32
    return %c0_i32, %arg0 : i32, i32
  }
  func.func @transform_2(%arg0: i32, %arg1: i32) -> (i32, i32) {
    %c0_i32 = arith.constant 0 : i32
    %c0_i32_0 = arith.constant 0 : i32
    return %c0_i32, %arg0 : i32, i32
  }
  func.func @transform_3(%arg0: i32, %arg1: i32) -> (i32, i32) {
    %c0_i32 = arith.constant 0 : i32
    return %arg1, %arg0 : i32, i32
  }
}

</mosaic_0001>

<bundles_post_ra>
// kernel: tpu_custom_call.1
= control target key start
LH: loop header
LB: loop body
LE: loop exit
PB: predicated region body
PF: predicated region fallthrough
CT: control target
= control target key end

     0   :  { %vm73_vm0 = vcmask 523264   ;;  %s362_s0 = inlined_call_operand.vmem [shape: f32[96,64], index: 0, kind: input, shape index: {}]   ;;  %s363_s1 = inlined_call_operand.vmem [shape: bf16[64,128], index: 1, kind: input, shape index: {}]   ;;  %s364_s2 = inlined_call_operand.vmem [shape: f32[1,128], index: 2, kind: input, shape index: {}]   ;;  %s365_s3 = inlined_call_operand.hbm [shape: f32[96,128], index: 3, kind: output, shape index: {}]  }
   0x1   :  { %v253_v0 = vld [vmem:[%s363_s1 + $0x18] sm:$0xff]   ;;  %v254_v1 = vld [vmem:[%s363_s1 + $0x10] sm:$0xff]   ;;  %v255_v2 = vld [vmem:[%s363_s1 + $0x8] sm:$0xff]  }
   0x2   :  { %242 = vmatprep.subr.bf16.mxu1 %v253_v0  ;;  %222 = vmatprep.subr.bf16.mxu0 %v253_v0  ;;  %v20_v3 = vld [vmem:[%s362_s0 + $0x20] sm:$0xff]  ;;  %v21_v4 = vld [vmem:[%s362_s0 + $0x28] sm:$0xff] }
   0x3   :  { %246 = vmatpush3.bf16.msra.mxu1 %v253_v0  ;;  %223 = vmatpush3.bf16.msra.mxu0 %v253_v0  ;;  %v30_v5 = vpack.c.bf16 %v21_v4, %v20_v3  ;;  %v16_v6 = vld [vmem:[%s362_s0] sm:$0xff]  ;;  %v17_v7 = vld [vmem:[%s362_s0 + $0x8] sm:$0xff] }
   0x4   :  { %243 = vmatprep.subr.bf16.mxu1 %v254_v1  ;;  %224 = vmatprep.subr.bf16.mxu0 %v254_v1  ;;  %v28_v8 = vpack.c.bf16 %v17_v7, %v16_v6  ;;  %v256_v9 = vld [vmem:[%s363_s1] sm:$0xff]  }
   0x7   :  { %247 = vmatpush3.bf16.msra.mxu1 %v254_v1  ;;  %225 = vmatpush3.bf16.msra.mxu0 %v254_v1 }
   0x8   :  { %244 = vmatprep.subr.bf16.mxu1 %v255_v2  ;;  %226 = vmatprep.subr.bf16.mxu0 %v255_v2 }
   0x9   :  { %8 = vsyncpa [#allocation3], 0  ;;  %234 = vmatprep.mubr.msk.bf16.mxu1 %vm73_vm0, %v30_v5  ;;  %230 = vmatprep.mubr.msk.bf16.mxu0 %vm73_vm0, %v28_v8  ;;  %v22_v10 = vld [vmem:[%s362_s0 + $0x30] sm:$0xff]  ;;  %v23_v11 = vld [vmem:[%s362_s0 + $0x38] sm:$0xff] }
   0xa   :  { %v18_v12 = vld [vmem:[%s362_s0 + $0x10] sm:$0xff]  ;;  %v19_v13 = vld [vmem:[%s362_s0 + $0x18] sm:$0xff]  ;;  %v24_v14 = vld [vmem:[%s362_s0 + $0x40] sm:$0xff]  ;;  %v31_v16 = vpack.c.bf16 %v23_v11, %v22_v10 }
   0xb   :  { %248 = vmatpush3.bf16.msra.mxu1 %v255_v2  ;;  %227 = vmatpush3.bf16.msra.mxu0 %v255_v2  ;;  %v25_v15 = vld [vmem:[%s362_s0 + $0x48] sm:$0xff]  ;;  %v29_v17 = vpack.c.bf16 %v19_v13, %v18_v12  ;;  %v26_v19 = vld [vmem:[%s362_s0 + $0x50] sm:$0xff]  ;;  %v27_v20 = vld [vmem:[%s362_s0 + $0x58] sm:$0xff]  ;;  %s279_s0 = smov [#allocation2]  }
   0xc   :  { %245 = vmatprep.subr.bf16.mxu1 %v256_v9  ;;  %228 = vmatprep.subr.bf16.mxu0 %v256_v9  ;;  %v32_v18 = vpack.c.bf16 %v25_v15, %v24_v14  ;;  %v33_v21 = vpack.c.bf16 %v27_v20, %v26_v19  ;;  %v201_v22 = vld [vmem:[%s364_s2] ss:$0 sm:$0xff]  ;;  %s190_s2 = sshll.u32 %s279_s0, 4  ;;  %s191_s2 = int_to_ptr.vmem [resolvable:$true] %s190_s2 }
   0xd   :  { %s257_s18 = scalar_lea.vmem %s191_s2, 1536  ;;  %p262_p1 = scmp.lt.s32.totalorder %s191_s2, %s191_s2 }
   0xe   :  { %p258_p0 = scmp.ne.s32.totalorder %s191_s2, %s257_s18  ;;  %p263_p2 = scmp.lt.s32.totalorder %s257_s18, %s257_s18 }
   0xf   :  { %249 = vmatpush3.bf16.msra.mxu1 %v256_v9  ;;  %229 = vmatpush3.bf16.msra.mxu0 %v256_v9 }
  0x10   :  { %p264_p3 = por %p263_p2, %p262_p1 }
  0x12   :  { %235 = vmatmul.mubr.msk.bf16.vlgmr.msra.gmra.mxu1 %vm73_vm0, %v31_v16  ;;  %231 = vmatmul.mubr.msk.bf16.vlgmr.msra.gmra.mxu0 %vm73_vm0, %v29_v17  ;;  %p265_p4 = pnand %p264_p3, %p258_p0 }
  0x13   :  { %238 = vmatprep.mubr.msk.bf16.mxu1 %vm73_vm0, %v32_v18 }
  0x1a   :  { %239 = vmatmul.mubr.msk.bf16.gmra.mxu1 %vm73_vm0, %v33_v21 }
  0xd2   :  { %v236_v23 = vpop.f32.mrf.mxu1  ;;  %v232_v24 = vpop.f32.mrf.mxu0 }
  0xd3   :  { %v151_v25 = vadd.f32 %v236_v23, %v201_v22  ;;  %v135_v26 = vadd.f32 %v232_v24, %v201_v22 }
  0xd4   :  { %v142_v27 = vpop.f32.mrf.mxu1  ;;  %v126_v28 = vpop.f32.mrf.mxu0 }
  0xd5   :  { %179 = vst [vmem:[#allocation2 + $0x30] sm:$0xff] %v151_v25  ;;  %175 = vst [vmem:[#allocation2 + $0x10] sm:$0xff] %v135_v26  ;;  %v143_v29 = vadd.f32 %v201_v22, %v142_v27  ;;  %v127_v30 = vadd.f32 %v201_v22, %v126_v28 }
  0xd6   :  { %v237_v31 = vpop.f32.mrf.mxu1  ;;  %v233_v32 = vpop.f32.mrf.mxu0 }
  0xd7   :  { %177 = vst [vmem:[#allocation2 + $0x20] sm:$0xff] %v143_v29  ;;  %173 = vst [vmem:[#allocation2] sm:$0xff] %v127_v30  ;;  %v154_v33 = vadd.f32 %v237_v31, %v201_v22  ;;  %v138_v34 = vadd.f32 %v233_v32, %v201_v22 }
  0xd8   :  { %v145_v35 = vpop.f32.mrf.mxu1  ;;  %v129_v36 = vpop.f32.mrf.mxu0 }
  0xd9   :  { %180 = vst [vmem:[#allocation2 + $0x38] sm:$0xff] %v154_v33  ;;  %176 = vst [vmem:[#allocation2 + $0x18] sm:$0xff] %v138_v34  ;;  %v146_v37 = vadd.f32 %v201_v22, %v145_v35  ;;  %v130_v38 = vadd.f32 %v201_v22, %v129_v36 }
  0xda   :  { %v240_v39 = vpop.f32.mrf.mxu1 }
  0xdb   :  { %178 = vst [vmem:[#allocation2 + $0x28] sm:$0xff] %v146_v37  ;;  %174 = vst [vmem:[#allocation2 + $0x8] sm:$0xff] %v130_v38  ;;  %v167_v40 = vadd.f32 %v240_v39, %v201_v22 }
  0xdc   :  { %v158_v41 = vpop.f32.mrf.mxu1 }
  0xdd   :  { %183 = vst [vmem:[#allocation2 + $0x50] sm:$0xff] %v167_v40  ;;  %v159_v42 = vadd.f32 %v201_v22, %v158_v41 }
  0xde   :  { %v241_v43 = vpop.f32.mrf.mxu1 }
  0xdf   :  { %181 = vst [vmem:[#allocation2 + $0x40] sm:$0xff] %v159_v42  ;;  %v170_v44 = vadd.f32 %v241_v43, %v201_v22 }
  0xe0   :  { %v161_v45 = vpop.f32.mrf.mxu1 }
  0xe1   :  { %184 = vst [vmem:[#allocation2 + $0x58] sm:$0xff] %v170_v44  ;;  %v162_v46 = vadd.f32 %v201_v22, %v161_v45 }
  0xe3   :  { %182 = vst [vmem:[#allocation2 + $0x48] sm:$0xff] %v162_v46 }
  0xe4   :  { %268 = shalt.err (!%p265_p4)
}
  0xe5   :  { %s280_s19 = smov 128   ;;  %s281_s20 = smov 8  }
  0xe6   :  { %196 = dma.vmem_to_hbm [thread:$0]  %s191_s2, 1536, %s365_s3, [#allocation3], %s280_s19, %s280_s19, %s281_s20  }
  0xe7   :  { %277 = dma.done.wait [#allocation3], 1536  }
  0xe8   :  { %278 = vsyncadd [#allocation3], 4294965760 }
  0xe9   :  { %200 = vsyncpa [#allocation3], 1 }

// kernel: tpu_custom_call.1
= control target key start
LH: loop header
LB: loop body
LE: loop exit
PB: predicated region body
PF: predicated region fallthrough
CT: control target
= control target key end

     0   :  { %vm73_vm0 = vcmask 523264   ;;  %s362_s0 = inlined_call_operand.vmem [shape: f32[96,64], index: 0, kind: input, shape index: {}]   ;;  %s363_s1 = inlined_call_operand.vmem [shape: bf16[64,128], index: 1, kind: input, shape index: {}]   ;;  %s364_s2 = inlined_call_operand.vmem [shape: f32[1,128], index: 2, kind: input, shape index: {}]   ;;  %s365_s3 = inlined_call_operand.hbm [shape: f32[96,128], index: 3, kind: output, shape index: {}]  }
   0x1   :  { %v253_v0 = vld [vmem:[%s363_s1 + $0x18] sm:$0xff]   ;;  %v254_v1 = vld [vmem:[%s363_s1 + $0x10] sm:$0xff]   ;;  %v255_v2 = vld [vmem:[%s363_s1 + $0x8] sm:$0xff]  }
   0x2   :  { %242 = vmatprep.subr.bf16.mxu1 %v253_v0  ;;  %222 = vmatprep.subr.bf16.mxu0 %v253_v0  ;;  %v20_v3 = vld [vmem:[%s362_s0 + $0x20] sm:$0xff]  ;;  %v21_v4 = vld [vmem:[%s362_s0 + $0x28] sm:$0xff] }
   0x3   :  { %246 = vmatpush3.bf16.msra.mxu1 %v253_v0  ;;  %223 = vmatpush3.bf16.msra.mxu0 %v253_v0  ;;  %v30_v5 = vpack.c.bf16 %v21_v4, %v20_v3  ;;  %v16_v6 = vld [vmem:[%s362_s0] sm:$0xff]  ;;  %v17_v7 = vld [vmem:[%s362_s0 + $0x8] sm:$0xff] }
   0x4   :  { %243 = vmatprep.subr.bf16.mxu1 %v254_v1  ;;  %224 = vmatprep.subr.bf16.mxu0 %v254_v1  ;;  %v28_v8 = vpack.c.bf16 %v17_v7, %v16_v6  ;;  %v256_v9 = vld [vmem:[%s363_s1] sm:$0xff]  }
   0x7   :  { %247 = vmatpush3.bf16.msra.mxu1 %v254_v1  ;;  %225 = vmatpush3.bf16.msra.mxu0 %v254_v1 }
   0x8   :  { %244 = vmatprep.subr.bf16.mxu1 %v255_v2  ;;  %226 = vmatprep.subr.bf16.mxu0 %v255_v2 }
   0x9   :  { %8 = vsyncpa [#allocation3], 0  ;;  %234 = vmatprep.mubr.msk.bf16.mxu1 %vm73_vm0, %v30_v5  ;;  %230 = vmatprep.mubr.msk.bf16.mxu0 %vm73_vm0, %v28_v8  ;;  %v22_v10 = vld [vmem:[%s362_s0 + $0x30] sm:$0xff]  ;;  %v23_v11 = vld [vmem:[%s362_s0 + $0x38] sm:$0xff] }
   0xa   :  { %v18_v12 = vld [vmem:[%s362_s0 + $0x10] sm:$0xff]  ;;  %v19_v13 = vld [vmem:[%s362_s0 + $0x18] sm:$0xff]  ;;  %v24_v14 = vld [vmem:[%s362_s0 + $0x40] sm:$0xff]  ;;  %v31_v16 = vpack.c.bf16 %v23_v11, %v22_v10 }
   0xb   :  { %248 = vmatpush3.bf16.msra.mxu1 %v255_v2  ;;  %227 = vmatpush3.bf16.msra.mxu0 %v255_v2  ;;  %v25_v15 = vld [vmem:[%s362_s0 + $0x48] sm:$0xff]  ;;  %v29_v17 = vpack.c.bf16 %v19_v13, %v18_v12  ;;  %v26_v19 = vld [vmem:[%s362_s0 + $0x50] sm:$0xff]  ;;  %v27_v20 = vld [vmem:[%s362_s0 + $0x58] sm:$0xff]  ;;  %s279_s0 = smov [#allocation2]  }
   0xc   :  { %245 = vmatprep.subr.bf16.mxu1 %v256_v9  ;;  %228 = vmatprep.subr.bf16.mxu0 %v256_v9  ;;  %v32_v18 = vpack.c.bf16 %v25_v15, %v24_v14  ;;  %v33_v21 = vpack.c.bf16 %v27_v20, %v26_v19  ;;  %v201_v22 = vld [vmem:[%s364_s2] ss:$0 sm:$0xff]  ;;  %s190_s2 = sshll.u32 %s279_s0, 4  ;;  %s191_s2 = int_to_ptr.vmem [resolvable:$true] %s190_s2 }
   0xd   :  { %s257_s18 = scalar_lea.vmem %s191_s2, 1536  ;;  %p262_p1 = scmp.lt.s32.totalorder %s191_s2, %s191_s2 }
   0xe   :  { %p258_p0 = scmp.ne.s32.totalorder %s191_s2, %s257_s18  ;;  %p263_p2 = scmp.lt.s32.totalorder %s257_s18, %s257_s18 }
   0xf   :  { %249 = vmatpush3.bf16.msra.mxu1 %v256_v9  ;;  %229 = vmatpush3.bf16.msra.mxu0 %v256_v9 }
  0x10   :  { %p264_p3 = por %p263_p2, %p262_p1 }
  0x12   :  { %235 = vmatmul.mubr.msk.bf16.vlgmr.msra.gmra.mxu1 %vm73_vm0, %v31_v16  ;;  %231 = vmatmul.mubr.msk.bf16.vlgmr.msra.gmra.mxu0 %vm73_vm0, %v29_v17  ;;  %p265_p4 = pnand %p264_p3, %p258_p0 }
  0x13   :  { %238 = vmatprep.mubr.msk.bf16.mxu1 %vm73_vm0, %v32_v18 }
  0x1a   :  { %239 = vmatmul.mubr.msk.bf16.gmra.mxu1 %vm73_vm0, %v33_v21 }
  0xd2   :  { %v236_v23 = vpop.f32.mrf.mxu1  ;;  %v232_v24 = vpop.f32.mrf.mxu0 }
  0xd3   :  { %v151_v25 = vadd.f32 %v236_v23, %v201_v22  ;;  %v135_v26 = vadd.f32 %v232_v24, %v201_v22 }
  0xd4   :  { %v142_v27 = vpop.f32.mrf.mxu1  ;;  %v126_v28 = vpop.f32.mrf.mxu0 }
  0xd5   :  { %179 = vst [vmem:[#allocation2 + $0x30] sm:$0xff] %v151_v25  ;;  %175 = vst [vmem:[#allocation2 + $0x10] sm:$0xff] %v135_v26  ;;  %v143_v29 = vadd.f32 %v201_v22, %v142_v27  ;;  %v127_v30 = vadd.f32 %v201_v22, %v126_v28 }
  0xd6   :  { %v237_v31 = vpop.f32.mrf.mxu1  ;;  %v233_v32 = vpop.f32.mrf.mxu0 }
  0xd7   :  { %177 = vst [vmem:[#allocation2 + $0x20] sm:$0xff] %v143_v29  ;;  %173 = vst [vmem:[#allocation2] sm:$0xff] %v127_v30  ;;  %v154_v33 = vadd.f32 %v237_v31, %v201_v22  ;;  %v138_v34 = vadd.f32 %v233_v32, %v201_v22 }
  0xd8   :  { %v145_v35 = vpop.f32.mrf.mxu1  ;;  %v129_v36 = vpop.f32.mrf.mxu0 }
  0xd9   :  { %180 = vst [vmem:[#allocation2 + $0x38] sm:$0xff] %v154_v33  ;;  %176 = vst [vmem:[#allocation2 + $0x18] sm:$0xff] %v138_v34  ;;  %v146_v37 = vadd.f32 %v201_v22, %v145_v35  ;;  %v130_v38 = vadd.f32 %v201_v22, %v129_v36 }
  0xda   :  { %v240_v39 = vpop.f32.mrf.mxu1 }
  0xdb   :  { %178 = vst [vmem:[#allocation2 + $0x28] sm:$0xff] %v146_v37  ;;  %174 = vst [vmem:[#allocation2 + $0x8] sm:$0xff] %v130_v38  ;;  %v167_v40 = vadd.f32 %v240_v39, %v201_v22 }
  0xdc   :  { %v158_v41 = vpop.f32.mrf.mxu1 }
  0xdd   :  { %183 = vst [vmem:[#allocation2 + $0x50] sm:$0xff] %v167_v40  ;;  %v159_v42 = vadd.f32 %v201_v22, %v158_v41 }
  0xde   :  { %v241_v43 = vpop.f32.mrf.mxu1 }
  0xdf   :  { %181 = vst [vmem:[#allocation2 + $0x40] sm:$0xff] %v159_v42  ;;  %v170_v44 = vadd.f32 %v241_v43, %v201_v22 }
  0xe0   :  { %v161_v45 = vpop.f32.mrf.mxu1 }
  0xe1   :  { %184 = vst [vmem:[#allocation2 + $0x58] sm:$0xff] %v170_v44  ;;  %v162_v46 = vadd.f32 %v201_v22, %v161_v45 }
  0xe3   :  { %182 = vst [vmem:[#allocation2 + $0x48] sm:$0xff] %v162_v46 }
  0xe4   :  { %268 = shalt.err (!%p265_p4)
}
  0xe5   :  { %s280_s19 = smov 128   ;;  %s281_s20 = smov 8  }
  0xe6   :  { %196 = dma.vmem_to_hbm [thread:$0]  %s191_s2, 1536, %s365_s3, [#allocation3], %s280_s19, %s280_s19, %s281_s20  }
  0xe7   :  { %277 = dma.done.wait [#allocation3], 1536  }
  0xe8   :  { %278 = vsyncadd [#allocation3], 4294965760 }
  0xe9   :  { %200 = vsyncpa [#allocation3], 1 }

</bundles_post_ra>
